<compile_context>
chip_gen: v7x
topology: tpu7x:2x2x1
jax: 0.10.0
libtpu: 0.0.40
codegen_flags: <defaults>
</compile_context>

<pallas_src>
import math

import jax
import jax.numpy as jnp
from jax import lax
from jax.experimental import pallas as pl
from jax.experimental.pallas import tpu as pltpu

HIDDEN = 128


def _mlp_kernel(x_ref, w1_ref, wh_ref, w3_ref, pk_ref, o_ref):
    """One (TM, input_dim) f32 batch tile -> one (1, TM) f32 output row."""
    pk = pk_ref[...]                        # (8, 128) f32: b1, b2, b21, b22, b3
    x = x_ref[...].astype(jnp.bfloat16)     # cast on the VPU; x read as f32

    # linear1 + relu1 (bf16 MXU operands, f32 accumulation)
    h = jnp.dot(x, w1_ref[...], preferred_element_type=jnp.float32)
    h = jnp.maximum(h + pk[0:1, :], 0.0).astype(jnp.bfloat16)

    # linear2 / linear21 / linear22 + relu (weights packed as (3,128,128) bf16)
    for j in range(3):
        y = jnp.dot(h, wh_ref[j], preferred_element_type=jnp.float32)
        h = jnp.maximum(y + pk[j + 1:j + 2, :], 0.0).astype(jnp.bfloat16)

    # linear3 (128 -> 1), no activation.  Computed as w3 . h^T so the tile's
    # result is a lane-dense (1, TM) row.  w3_ref is (8,128) bf16 with row 0
    # holding w3 and rows 1..7 zero (keeps the MXU M-dim aligned).
    outs = lax.dot_general(w3_ref[...], h, (((1,), (1,)), ((), ())),
                           preferred_element_type=jnp.float32)   # (8, TM)
    o_ref[...] = (outs[0:1, :] + pk[4:5, 0:1]).astype(o_ref.dtype)


def _round_up(a, b):
    return ((a + b - 1) // b) * b


def approx_net_forward(x, params, *, tm=1024):
    """x: (B, input_dim) f32.  params as produced by init_params."""
    B, input_dim = x.shape
    H = HIDDEN

    if B >= 256:
        # Multi-tile path: tm must be a multiple of 128 (lane-dense output
        # blocks) and is capped so the grid has >= 2 steps (v7x megacore).
        tm_eff = min(int(tm), _round_up(pl.cdiv(B, 2), 128))
        tm_eff = max(128, (tm_eff // 128) * 128)
    else:
        # Small batch: single tile, round up to a sublane multiple only.
        tm_eff = max(8, _round_up(B, 8))

    Bp = _round_up(B, tm_eff)
    grid = (Bp // tm_eff,)

    # Pad only when the batch is ragged (avoids an extra HBM pass otherwise).
    xp = x if Bp == B else jnp.pad(x, ((0, Bp - B), (0, 0)))

    # Resident operands (constant index_map => DMA'd once, stay in VMEM).
    w1 = params["w1"].astype(jnp.bfloat16)                           # (in, 128)
    wh = jnp.stack([params["w2"], params["w21"], params["w22"]]
                   ).astype(jnp.bfloat16)                            # (3,128,128)
    w3p = jnp.concatenate([params["w3"],
                           jnp.zeros((7, H), jnp.float32)], axis=0
                          ).astype(jnp.bfloat16)                     # (8, 128)
    b3_row = jnp.broadcast_to(params["b3"].reshape(1, 1), (1, H))
    pk = jnp.concatenate([params["b1"], params["b2"], params["b21"],
                          params["b22"], b3_row,
                          jnp.zeros((3, H), jnp.float32)], axis=0)   # (8, 128)

    flops = 2 * Bp * (input_dim * H + 3 * H * H + H)
    bytes_accessed = int(xp.size * 4 + Bp * 4
                         + w1.size * 2 + wh.size * 2 + w3p.size * 2 + pk.size * 4)

    out = pl.pallas_call(
        _mlp_kernel,
        out_shape=jax.ShapeDtypeStruct((1, Bp), jnp.float32),
        grid=grid,
        in_specs=[
            pl.BlockSpec((tm_eff, input_dim), lambda i: (i, 0)),  # x tile (pipelined, f32)
            pl.BlockSpec((input_dim, H), lambda i: (0, 0)),       # w1  (resident)
            pl.BlockSpec((3, H, H), lambda i: (0, 0, 0)),         # w2/w21/w22 (resident)
            pl.BlockSpec((8, H), lambda i: (0, 0)),               # w3 padded   (resident)
            pl.BlockSpec((8, H), lambda i: (0, 0)),               # biases + b3 (resident)
        ],
        out_specs=pl.BlockSpec((1, tm_eff), lambda i: (0, i)),    # lane-dense row per tile
        compiler_params=pltpu.CompilerParams(
            dimension_semantics=("parallel",),    # shard batch tiles across TCs (v7x)
            vmem_limit_bytes=32 * 1024 * 1024,    # explicit; safe on v7x's 64 MiB part
        ),
        cost_estimate=pl.CostEstimate(flops=flops, transcendentals=0,
                                      bytes_accessed=bytes_accessed),
    )(xp, w1, wh, w3p, pk)

    return out.reshape(Bp, 1)[:B]


def init_params(key, input_dim, hidden=HIDDEN):
    """Mirrors Approx_net.__init__: weights ~ N(0, std) with std=0.1 (4x) and
    std=1 for the last layer; biases follow PyTorch's U(-1/sqrt(fan_in), +)."""
    keys = jax.random.split(key, 10)

    def w_init(k, fan_in, fan_out, std):
        # PyTorch weight is (out, in); store transposed (in, out) for x @ W.
        return std * jax.random.normal(k, (fan_in, fan_out), jnp.float32)

    def b_init(k, fan_in, fan_out):
        bound = 1.0 / math.sqrt(fan_in)
        return jax.random.uniform(k, (1, fan_out), jnp.float32, -bound, bound)

    return {
        "w1":  w_init(keys[0], input_dim, hidden, 0.1),
        "b1":  b_init(keys[1], input_dim, hidden),
        "w2":  w_init(keys[2], hidden, hidden, 0.1),
        "b2":  b_init(keys[3], hidden, hidden),
        "w21": w_init(keys[4], hidden, hidden, 0.1),
        "b21": b_init(keys[5], hidden, hidden),
        "w22": w_init(keys[6], hidden, hidden, 0.1),
        "b22": b_init(keys[7], hidden, hidden),
        # Last layer stored as a (1, 128) row.
        "w3":  w_init(keys[8], hidden, 1, 1.0).reshape(1, hidden),
        "b3":  b_init(keys[9], hidden, 1),
    }


def reference_forward_bf16(x, p):
    """Pure-JAX reference matching the kernel's bf16-operand / f32-accumulate
    math (bf16 inter-layer activations, bf16 final matmul)."""
    def dr(h, w, b):
        y = jnp.dot(h.astype(jnp.bfloat16), w.astype(jnp.bfloat16),
                    preferred_element_type=jnp.float32)
        return jnp.maximum(y + b, 0.0).astype(jnp.bfloat16)

    h = dr(x, p["w1"], p["b1"])
    h = dr(h, p["w2"], p["b2"])
    h = dr(h, p["w21"], p["b21"])
    h = dr(h, p["w22"], p["b22"])
    w3 = p["w3"].astype(jnp.bfloat16)
    return jnp.dot(h, w3.T, preferred_element_type=jnp.float32) + p["b3"]


def reference_forward_f32(x, p):
    """Full-f32 reference of the original module (informational comparison)."""
    h = jnp.maximum(x @ p["w1"] + p["b1"], 0.0)
    h = jnp.maximum(h @ p["w2"] + p["b2"], 0.0)
    h = jnp.maximum(h @ p["w21"] + p["b21"], 0.0)
    h = jnp.maximum(h @ p["w22"] + p["b22"], 0.0)
    return jnp.sum(h * p["w3"], axis=-1, keepdims=True) + p["b3"]


if __name__ == "__main__":
    key = jax.random.PRNGKey(0)
    k_params, k_x, k_x2 = jax.random.split(key, 3)

    input_dim = 32
    params = init_params(k_params, input_dim)

    # Small batch (single-tile path).
    x = jax.random.normal(k_x, (8, input_dim), jnp.float32)
    out = jax.block_until_ready(approx_net_forward(x, params))
    assert out.shape == (8, 1)
    ref = reference_forward_bf16(x, params)
    assert jnp.allclose(out, ref, atol=5e-3, rtol=5e-3), "mismatch (small batch)"

    # Larger batch (multi-tile, lane-dense output, ragged-tail padding).
    x2 = jax.random.normal(k_x2, (384, input_dim), jnp.float32)
    out2 = jax.block_until_ready(approx_net_forward(x2, params))
    assert out2.shape == (384, 1)
    ref2 = reference_forward_bf16(x2, params)
    assert jnp.allclose(out2, ref2, atol=5e-3, rtol=5e-3), "mismatch (multi-tile)"

    # Informational only: bf16 MXU operands vs the original f32 module
    # introduce ~1% relative error (expected, not asserted).
    _max_diff_vs_f32 = float(jnp.max(jnp.abs(out - reference_forward_f32(x, params))))

    print("KERNEL_OK")
</pallas_src>

<mosaic_0001>
module attributes {stable_mosaic.version = 11 : i64} {
  func.func @_mlp_kernel(%arg0: i32, %arg1: memref<8x32xf32, #tpu.memory_space<vmem>>, %arg2: memref<32x128xbf16, #tpu.memory_space<vmem>>, %arg3: memref<3x128x128xbf16, #tpu.memory_space<vmem>>, %arg4: memref<8x128xbf16, #tpu.memory_space<vmem>>, %arg5: memref<8x128xf32, #tpu.memory_space<vmem>>, %arg6: memref<1x8xf32, #tpu.memory_space<vmem>>) attributes {dimension_semantics = [#tpu.dimension_semantics<parallel>], iteration_bounds = array<i64: 1>, scalar_prefetch = 0 : i64, scratch_operands = 0 : i64, tpu.core_type = #tpu.core_type<tc>, window_params = [{transform_indices = @transform_0, window_bounds = array<i64: 8, 32>}, {pipeline_mode = #tpu.pipeline_mode<synchronous>, transform_indices = @transform_1, window_bounds = array<i64: 32, 128>}, {pipeline_mode = #tpu.pipeline_mode<synchronous>, transform_indices = @transform_2, window_bounds = array<i64: 3, 128, 128>}, {pipeline_mode = #tpu.pipeline_mode<synchronous>, transform_indices = @transform_3, window_bounds = array<i64: 8, 128>}, {pipeline_mode = #tpu.pipeline_mode<synchronous>, transform_indices = @transform_4, window_bounds = array<i64: 8, 128>}, {transform_indices = @transform_5, window_bounds = array<i64: 1, 8>}]} {
    %c0 = arith.constant 0 : index
    %c0_0 = arith.constant 0 : index
    %0 = vector.load %arg5[%c0, %c0_0] : memref<8x128xf32, #tpu.memory_space<vmem>>, vector<8x128xf32>
    %c0_1 = arith.constant 0 : index
    %c0_2 = arith.constant 0 : index
    %1 = vector.load %arg1[%c0_1, %c0_2] : memref<8x32xf32, #tpu.memory_space<vmem>>, vector<8x32xf32>
    %2 = arith.truncf %1 : vector<8x32xf32> to vector<8x32xbf16>
    %c0_3 = arith.constant 0 : index
    %c0_4 = arith.constant 0 : index
    %3 = vector.load %arg2[%c0_3, %c0_4] : memref<32x128xbf16, #tpu.memory_space<vmem>>, vector<32x128xbf16>
    %cst = arith.constant dense<0.000000e+00> : vector<8x128xf32>
    %4 = tpu.matmul %2, %3, %cst {dimension_numbers = #tpu.dot_dimension_numbers<[1], [0], [0], [1], [0, 0, 1, 1], [], []>} : vector<8x32xbf16>, vector<32x128xbf16>, vector<8x128xf32> -> vector<8x128xf32>
    %5 = vector.extract_strided_slice %0 {offsets = [0, 0], sizes = [1, 128], strides = [1, 1]} : vector<8x128xf32> to vector<1x128xf32>
    %6 = vector.broadcast %5 : vector<1x128xf32> to vector<8x128xf32>
    %7 = arith.addf %4, %6 : vector<8x128xf32>
    %cst_5 = arith.constant 0.000000e+00 : f32
    %8 = vector.broadcast %cst_5 : f32 to vector<8x128xf32>
    %9 = arith.maximumf %7, %8 : vector<8x128xf32>
    %10 = arith.truncf %9 : vector<8x128xf32> to vector<8x128xbf16>
    %c0_6 = arith.constant 0 : index
    %c0_7 = arith.constant 0 : index
    %c0_8 = arith.constant 0 : index
    %11 = vector.load %arg3[%c0_6, %c0_7, %c0_8] : memref<3x128x128xbf16, #tpu.memory_space<vmem>>, vector<1x128x128xbf16>
    %12 = vector.shape_cast %11 : vector<1x128x128xbf16> to vector<128x128xbf16>
    %cst_9 = arith.constant dense<0.000000e+00> : vector<8x128xf32>
    %13 = tpu.matmul %10, %12, %cst_9 {dimension_numbers = #tpu.dot_dimension_numbers<[1], [0], [0], [1], [0, 0, 1, 1], [], []>} : vector<8x128xbf16>, vector<128x128xbf16>, vector<8x128xf32> -> vector<8x128xf32>
    %14 = vector.extract_strided_slice %0 {offsets = [1, 0], sizes = [1, 128], strides = [1, 1]} : vector<8x128xf32> to vector<1x128xf32>
    %15 = vector.broadcast %14 : vector<1x128xf32> to vector<8x128xf32>
    %16 = arith.addf %13, %15 : vector<8x128xf32>
    %cst_10 = arith.constant 0.000000e+00 : f32
    %17 = vector.broadcast %cst_10 : f32 to vector<8x128xf32>
    %18 = arith.maximumf %16, %17 : vector<8x128xf32>
    %19 = arith.truncf %18 : vector<8x128xf32> to vector<8x128xbf16>
    %c1 = arith.constant 1 : index
    %c0_11 = arith.constant 0 : index
    %c0_12 = arith.constant 0 : index
    %20 = vector.load %arg3[%c1, %c0_11, %c0_12] : memref<3x128x128xbf16, #tpu.memory_space<vmem>>, vector<1x128x128xbf16>
    %21 = vector.shape_cast %20 : vector<1x128x128xbf16> to vector<128x128xbf16>
    %cst_13 = arith.constant dense<0.000000e+00> : vector<8x128xf32>
    %22 = tpu.matmul %19, %21, %cst_13 {dimension_numbers = #tpu.dot_dimension_numbers<[1], [0], [0], [1], [0, 0, 1, 1], [], []>} : vector<8x128xbf16>, vector<128x128xbf16>, vector<8x128xf32> -> vector<8x128xf32>
    %23 = vector.extract_strided_slice %0 {offsets = [2, 0], sizes = [1, 128], strides = [1, 1]} : vector<8x128xf32> to vector<1x128xf32>
    %24 = vector.broadcast %23 : vector<1x128xf32> to vector<8x128xf32>
    %25 = arith.addf %22, %24 : vector<8x128xf32>
    %cst_14 = arith.constant 0.000000e+00 : f32
    %26 = vector.broadcast %cst_14 : f32 to vector<8x128xf32>
    %27 = arith.maximumf %25, %26 : vector<8x128xf32>
    %28 = arith.truncf %27 : vector<8x128xf32> to vector<8x128xbf16>
    %c2 = arith.constant 2 : index
    %c0_15 = arith.constant 0 : index
    %c0_16 = arith.constant 0 : index
    %29 = vector.load %arg3[%c2, %c0_15, %c0_16] : memref<3x128x128xbf16, #tpu.memory_space<vmem>>, vector<1x128x128xbf16>
    %30 = vector.shape_cast %29 : vector<1x128x128xbf16> to vector<128x128xbf16>
    %cst_17 = arith.constant dense<0.000000e+00> : vector<8x128xf32>
    %31 = tpu.matmul %28, %30, %cst_17 {dimension_numbers = #tpu.dot_dimension_numbers<[1], [0], [0], [1], [0, 0, 1, 1], [], []>} : vector<8x128xbf16>, vector<128x128xbf16>, vector<8x128xf32> -> vector<8x128xf32>
    %32 = vector.extract_strided_slice %0 {offsets = [3, 0], sizes = [1, 128], strides = [1, 1]} : vector<8x128xf32> to vector<1x128xf32>
    %33 = vector.broadcast %32 : vector<1x128xf32> to vector<8x128xf32>
    %34 = arith.addf %31, %33 : vector<8x128xf32>
    %cst_18 = arith.constant 0.000000e+00 : f32
    %35 = vector.broadcast %cst_18 : f32 to vector<8x128xf32>
    %36 = arith.maximumf %34, %35 : vector<8x128xf32>
    %37 = arith.truncf %36 : vector<8x128xf32> to vector<8x128xbf16>
    %c0_19 = arith.constant 0 : index
    %c0_20 = arith.constant 0 : index
    %38 = vector.load %arg4[%c0_19, %c0_20] : memref<8x128xbf16, #tpu.memory_space<vmem>>, vector<8x128xbf16>
    %cst_21 = arith.constant dense<0.000000e+00> : vector<8x8xf32>
    %39 = tpu.matmul %38, %37, %cst_21 {dimension_numbers = #tpu.dot_dimension_numbers<[1], [1], [0], [0], [0, 0, 1, 0], [], []>} : vector<8x128xbf16>, vector<8x128xbf16>, vector<8x8xf32> -> vector<8x8xf32>
    %40 = vector.extract_strided_slice %39 {offsets = [0, 0], sizes = [1, 8], strides = [1, 1]} : vector<8x8xf32> to vector<1x8xf32>
    %41 = vector.extract_strided_slice %0 {offsets = [4, 0], sizes = [1, 1], strides = [1, 1]} : vector<8x128xf32> to vector<1x1xf32>
    %42 = vector.broadcast %41 : vector<1x1xf32> to vector<1x8xf32>
    %43 = arith.addf %40, %42 : vector<1x8xf32>
    %c0_22 = arith.constant 0 : index
    %c0_23 = arith.constant 0 : index
    %44 = vector.load %arg6[%c0_22, %c0_23] : memref<1x8xf32, #tpu.memory_space<vmem>>, vector<1x8xf32>
    tpu.vector_store %arg6[%c0_22, %c0_23], %43 {strides = array<i32>} : memref<1x8xf32, #tpu.memory_space<vmem>>, vector<1x8xf32>,
    return
  }
  func.func @transform_0(%arg0: i32) -> (i32, i32) {
    %c0_i32 = arith.constant 0 : i32
    %c0_i32_0 = arith.constant 0 : i32
    return %arg0, %c0_i32 : i32, i32
  }
  func.func @transform_1(%arg0: i32) -> (i32, i32) {
    %c0_i32 = arith.constant 0 : i32
    %c0_i32_0 = arith.constant 0 : i32
    %c0_i32_1 = arith.constant 0 : i32
    return %c0_i32, %c0_i32_0 : i32, i32
  }
  func.func @transform_2(%arg0: i32) -> (i32, i32, i32) {
    %c0_i32 = arith.constant 0 : i32
    %c0_i32_0 = arith.constant 0 : i32
    %c0_i32_1 = arith.constant 0 : i32
    %c0_i32_2 = arith.constant 0 : i32
    return %c0_i32, %c0_i32_0, %c0_i32_1 : i32, i32, i32
  }
  func.func @transform_3(%arg0: i32) -> (i32, i32) {
    %c0_i32 = arith.constant 0 : i32
    %c0_i32_0 = arith.constant 0 : i32
    %c0_i32_1 = arith.constant 0 : i32
    return %c0_i32, %c0_i32_0 : i32, i32
  }
  func.func @transform_4(%arg0: i32) -> (i32, i32) {
    %c0_i32 = arith.constant 0 : i32
    %c0_i32_0 = arith.constant 0 : i32
    %c0_i32_1 = arith.constant 0 : i32
    return %c0_i32, %c0_i32_0 : i32, i32
  }
  func.func @transform_5(%arg0: i32) -> (i32, i32) {
    %c0_i32 = arith.constant 0 : i32
    %c0_i32_0 = arith.constant 0 : i32
    return %c0_i32, %arg0 : i32, i32
  }
}

</mosaic_0001>

<bundles_post_ra>
// kernel: tpu_custom_call.1
= control target key start
LH: loop header
LB: loop body
LE: loop exit
PB: predicated region body
PF: predicated region fallthrough
CT: control target
= control target key end

     0   :  { %10 = vsyncpa [#allocation3], 0  ;;  %s940_s0 = inlined_call_operand.hbm [shape: f32[8,32], index: 0, kind: input, shape index: {}]   ;;  %s941_s1 = inlined_call_operand.hbm [shape: bf16[32,128], index: 1, kind: input, shape index: {}]   ;;  %s942_s2 = inlined_call_operand.hbm [shape: bf16[3,128,128], index: 2, kind: input, shape index: {}]   ;;  %s943_s3 = inlined_call_operand.vmem [shape: bf16[8,128], index: 3, kind: input, shape index: {}]   ;;  %s944_s4 = inlined_call_operand.vmem [shape: f32[8,128], index: 4, kind: input, shape index: {}]   ;;  %s945_s5 = inlined_call_operand.hbm [shape: f32[1,8], index: 5, kind: output, shape index: {}]  }
   0x1   :  { %11 = vsyncpa [#allocation6], 0 }
   0x2   :  { %12 = vsyncpa [#allocation4], 0  ;;  %s791_s18 = smov [#allocation5]   ;;  %s697_s22 = scalar_lea.hbm %s941_s1, 256 }
   0x3   :  { %s28_s19 = sshll.u32 %s791_s18, 4  ;;  %p698_p0 = scmp.ne.s32.totalorder %s941_s1, %s697_s22  ;;  %s29_s19 = int_to_ptr.vmem [resolvable:$true] %s28_s19 }
   0x4   :  { %p701_p1 = scmp.lt.u32.totalorder %s697_s22, %s941_s1 }
   0x6   :  { %p703_p2 = pnand %p701_p1, %p698_p0 }
   0x8   :  { %706 = shalt.err (!%p703_p2)
}
   0x9   :  { %s707_s27 = scalar_lea.vmem %s29_s19, 256  ;;  %p712_p4 = scmp.lt.s32.totalorder %s29_s19, %s29_s19 }
   0xa   :  { %p708_p3 = scmp.ne.s32.totalorder %s29_s19, %s707_s27  ;;  %p713_p5 = scmp.lt.s32.totalorder %s707_s27, %s707_s27 }
   0xc   :  { %p714_p6 = por %p713_p5, %p712_p4 }
   0xe   :  { %p715_p7 = pnand %p714_p6, %p708_p3 }
  0x10   :  { %718 = shalt.err (!%p715_p7)
}
  0x11   :  { %s792_s28 = smov 64   ;;  %s793_s29 = smov 4  }
  0x12   :  { %34 = dma.hbm_to_vmem [thread:$0]  %s941_s1, 256, %s29_s19, [#allocation6], %s792_s28, %s792_s28, %s793_s29  }
  0x13   :  { %s794_s7 = smov [#allocation2]   ;;  %s795_s9 = smov [#allocation7]  }
  0x14   :  { %s19_s8 = sshll.u32 %s794_s7, 4  ;;  %s40_s10 = sshll.u32 %s795_s9, 4  ;;  %s20_s8 = int_to_ptr.vmem [resolvable:$true] %s19_s8  ;;  %s41_s10 = int_to_ptr.vmem [resolvable:$true] %s40_s10 }
  0x15   :  { %s719_s13 = scalar_lea.hbm %s940_s0, 128 }
  0x16   :  { %p720_p8 = scmp.ne.s32.totalorder %s940_s0, %s719_s13  ;;  %p723_p9 = scmp.lt.u32.totalorder %s719_s13, %s940_s0 }
  0x18   :  { %p725_p10 = pnand %p723_p9, %p720_p8 }
  0x1a   :  { %728 = shalt.err (!%p725_p10)
}
  0x1b   :  { %s729_s1 = scalar_lea.vmem %s20_s8, 128  ;;  %p734_p12 = scmp.lt.s32.totalorder %s20_s8, %s20_s8 }
  0x1c   :  { %p730_p11 = scmp.ne.s32.totalorder %s20_s8, %s729_s1  ;;  %p735_p13 = scmp.lt.s32.totalorder %s729_s1, %s729_s1 }
  0x1e   :  { %p736_p0 = por %p735_p13, %p734_p12 }
  0x20   :  { %p737_p1 = pnand %p736_p0, %p730_p11 }
  0x22   :  { %740 = shalt.err (!%p737_p1)
}
  0x23   :  { %22 = dma.hbm_to_vmem [thread:$0]  %s940_s0, 128, %s20_s8, [#allocation3]  }
  0x24   :  { %s741_s22 = scalar_lea.hbm %s942_s2, 3072 }
  0x25   :  { %p742_p2 = scmp.ne.s32.totalorder %s942_s2, %s741_s22  ;;  %p745_p3 = scmp.lt.u32.totalorder %s741_s22, %s942_s2 }
  0x27   :  { %p747_p4 = pnand %p745_p3, %p742_p2 }
  0x29   :  { %750 = shalt.err (!%p747_p4)
}
  0x2a   :  { %s751_s27 = scalar_lea.vmem %s41_s10, 3072  ;;  %p756_p6 = scmp.lt.s32.totalorder %s41_s10, %s41_s10 }
  0x2b   :  { %p752_p5 = scmp.ne.s32.totalorder %s41_s10, %s751_s27  ;;  %p757_p7 = scmp.lt.s32.totalorder %s751_s27, %s751_s27 }
  0x2d   :  { %p758_p8 = por %p757_p7, %p756_p6 }
  0x2f   :  { %p759_p9 = pnand %p758_p8, %p752_p5 }
  0x31   :  { %762 = shalt.err (!%p759_p9)
}
  0x32   :  { %46 = dma.hbm_to_vmem [thread:$0]  %s942_s2, 3072, %s41_s10, [#allocation6], %s792_s28, %s792_s28, %s793_s29  }
  0x33   :  { %785 = dma.done.wait [#allocation3], 128  }
  0x34   :  { %786 = vsyncadd [#allocation3], 4294967168 }
  0x35   :  { %787 = dma.done.wait [#allocation6], 3328  }
  0x36   :  { %788 = vsyncadd [#allocation6], 4294963968  ;;  %v796_v0 = vmov 0.0   ;;  %vm797_vm0 = vmmov 0   ;;  %v671_v1 = vld [vmem:[#allocation5] sm:$0xff]   ;;  %v672_v2 = vld [vmem:[#allocation5 + $0x8] sm:$0xff]   ;;  %v68_v19 = vlaneseq }
  0x37   :  { %587 = vmatprep.subr.bf16.mxu0 %v796_v0  ;;  %591 = vmatprep.mubr.msk.bf16.mxu0 %vm797_vm0, %v796_v0  ;;  %v62_v3 = vld [vmem:[#allocation2] sm:$0xff]  ;;  %v673_v4 = vld [vmem:[#allocation7] sm:$0xff]   ;;  %vm84_vm1 = vcmask 261120   ;;  %v675_v7 = vld [vmem:[#allocation7 + $0x10] sm:$0xff]   ;;  %v798_v59 = vmov 0   ;;  %s799_s6 = smov [#allocation8]  }
  0x38   :  { %595 = vmatprep.subr.bf16.mxu1 %v796_v0  ;;  %611 = vmatprep.mubr.msk.bf16.mxu1 %vm797_vm0, %v796_v0  ;;  %v63_v5 = vpack.c.bf16 %v62_v3, %v62_v3  ;;  %v674_v6 = vld [vmem:[#allocation7 + $0x8] sm:$0xff]   ;;  %v676_v8 = vld [vmem:[#allocation7 + $0x18] sm:$0xff]   ;;  %v677_v9 = vld [vmem:[#allocation7 + $0x20] sm:$0xff]   ;;  %v896_v20 = vshrl.u32 %v68_v19, 7  ;;  %s518_s7 = sshll.u32 %s799_s6, 4  ;;  %vm510_vm2 = vcmask 57344   ;;  %s519_s7 = int_to_ptr.vmem [resolvable:$true] %s518_s7 }
  0x39   :  { %588 = vmatpush3.bf16.msra.mxu0 %v671_v1  ;;  %596 = vmatpush3.bf16.msra.mxu1 %v673_v4  ;;  %v678_v10 = vld [vmem:[#allocation7 + $0x28] sm:$0xff]   ;;  %v679_v11 = vld [vmem:[#allocation7 + $0x30] sm:$0xff]   ;;  %v680_v12 = vld [vmem:[#allocation7 + $0x38] sm:$0xff]   ;;  %s763_s8 = scalar_lea.vmem %s519_s7, 16  ;;  %s767_s9 = scalar_lea.vmem %s519_s7, 32 }
  0x3a   :  { %589 = vmatprep.subr.bf16.mxu0 %v796_v0  ;;  %597 = vmatprep.subr.bf16.mxu1 %v796_v0  ;;  %v681_v13 = vld [vmem:[#allocation7 + $0x40] sm:$0xff]   ;;  %v682_v14 = vld [vmem:[#allocation7 + $0x48] sm:$0xff]   ;;  %v683_v15 = vld [vmem:[#allocation7 + $0x50] sm:$0xff]   ;;  %v70_v21 = vsub.s32 0, %v896_v20  ;;  %v148_v39 = vsub.s32 1, %v896_v20  ;;  %v259_v50 = vsub.s32 2, %v896_v20  ;;  %p764_p10 = scmp.ne.s32.totalorder %s519_s7, %s763_s8  ;;  %p768_p11 = scmp.lt.s32.totalorder %s519_s7, %s519_s7 }
  0x3b   :  { %v684_v16 = vld [vmem:[#allocation7 + $0x58] sm:$0xff]   ;;  %v685_v17 = vld [vmem:[#allocation7 + $0x60] sm:$0xff]   ;;  %v686_v18 = vld [vmem:[#allocation7 + $0x68] sm:$0xff]   ;;  %670 = vset.pattern.permute.xlu0 %v798_v59  ;;  %v370_v60 = vsub.s32 3, %v896_v20  ;;  %p769_p12 = scmp.lt.s32.totalorder %s767_s9, %s763_s8 }
  0x3c   :  { %v902_v22 = vld [vmem:[%s944_s4] sm:$0xff]  ;;  %v687_v31 = vld [vmem:[#allocation7 + $0x70] sm:$0xff]   ;;  %v688_v32 = vld [vmem:[#allocation7 + $0x78] sm:$0xff]  }
  0x3d   :  { %590 = vmatpush3.bf16.msra.mxu0 %v672_v2  ;;  %598 = vmatpush3.bf16.msra.mxu1 %v674_v6  ;;  %v71_v23 = vrot.slane %v902_v22, %v70_v21  ;;  %v689_v33 = vld [vmem:[#allocation7 + $0x80] sm:$0xff]   ;;  %v690_v34 = vld [vmem:[#allocation7 + $0x88] sm:$0xff]   ;;  %v691_v35 = vld [vmem:[#allocation7 + $0x90] sm:$0xff]   ;;  %v149_v40 = vrot.slane %v902_v22, %v148_v39  ;;  %v260_v51 = vrot.slane %v902_v22, %v259_v50  ;;  %p770_p13 = por %p769_p12, %p768_p11 }
  0x3e   :  { %615 = vmatprep.subr.bf16.mxu0 %v796_v0  ;;  %599 = vmatprep.subr.bf16.mxu1 %v796_v0  ;;  %v692_v36 = vld [vmem:[#allocation7 + $0x98] sm:$0xff]   ;;  %v693_v37 = vld [vmem:[#allocation7 + $0xa0] sm:$0xff]   ;;  %v694_v38 = vld [vmem:[#allocation7 + $0xa8] sm:$0xff]   ;;  %v371_v61 = vrot.slane %v902_v22, %v370_v60 }
  0x3f   :  { %v695_v48 = vld [vmem:[#allocation7 + $0xb0] sm:$0xff]   ;;  %v696_v49 = vld [vmem:[#allocation7 + $0xb8] sm:$0xff]   ;;  %505 = vperm.xlu0 %670, %v902_v22   ;;  %p771_p0 = pnand %p770_p13, %p764_p10 }
  0x40   :  { %592 = vmatmul.mubr.msk.bf16.vlgmr.msra.gmra.mrb[0].mxu0 %vm84_vm1, %v63_v5  ;;  %v462_v5 = vld [vmem:[%s943_s3] sm:$0xf] }
  0x41   :  { %631 = vmatprep.mubr.msk.bf16.mxu0 %vm797_vm0, %v796_v0  ;;  %600 = vmatpush3.bf16.msra.mxu1 %v675_v7 }
  0x42   :  { %601 = vmatprep.subr.bf16.mxu1 %v796_v0  ;;  %616 = vmatpush3.bf16.msra.mxu0 %v681_v13 }
  0x43   :  { %617 = vmatprep.subr.bf16.mxu0 %v796_v0 }
  0x45   :  { %602 = vmatpush3.bf16.msra.mxu1 %v676_v8 }
  0x46   :  { %603 = vmatprep.subr.bf16.mxu1 %v796_v0  ;;  %618 = vmatpush3.bf16.msra.mxu0 %v682_v14 }
  0x47   :  { %619 = vmatprep.subr.bf16.mxu0 %v796_v0 }
  0x49   :  { %604 = vmatpush3.bf16.msra.mxu1 %v677_v9 }
  0x4a   :  { %605 = vmatprep.subr.bf16.mxu1 %v796_v0  ;;  %620 = vmatpush3.bf16.msra.mxu0 %v683_v15 }
  0x4b   :  { %621 = vmatprep.subr.bf16.mxu0 %v796_v0 }
  0x4d   :  { %606 = vmatpush3.bf16.msra.mxu1 %v678_v10 }
  0x4e   :  { %607 = vmatprep.subr.bf16.mxu1 %v796_v0  ;;  %622 = vmatpush3.bf16.msra.mxu0 %v684_v16 }
  0x4f   :  { %623 = vmatprep.subr.bf16.mxu0 %v796_v0 }
  0x51   :  { %608 = vmatpush3.bf16.msra.mxu1 %v679_v11 }
  0x52   :  { %609 = vmatprep.subr.bf16.mxu1 %v796_v0  ;;  %624 = vmatpush3.bf16.msra.mxu0 %v685_v17 }
  0x53   :  { %625 = vmatprep.subr.bf16.mxu0 %v796_v0 }
  0x55   :  { %610 = vmatpush3.bf16.msra.mxu1 %v680_v12 }
  0x56   :  { %635 = vmatprep.subr.bf16.mxu1 %v796_v0  ;;  %626 = vmatpush3.bf16.msra.mxu0 %v686_v18 }
  0x57   :  { %627 = vmatprep.subr.bf16.mxu0 %v796_v0 }
  0x5a   :  { %628 = vmatpush3.bf16.msra.mxu0 %v687_v31 }
  0x5b   :  { %629 = vmatprep.subr.bf16.mxu0 %v796_v0 }
  0x5e   :  { %630 = vmatpush3.bf16.msra.mxu0 %v688_v32 }
  0x5f   :  { %655 = vmatprep.subr.bf16.mxu0 %v796_v0 }
  0xbe   :  { %v506_v6 = vpop.permute.xlu0 %505 }
  0xbf   :  { %v507_v7 = vrot.slane %v506_v6, 4 }
 0x113   :  { %v122_v24 = vpop.f32.mrb[0].mxu0 }
 0x114   :  { %v123_v25 = vadd.f32 %v122_v24, %v71_v23  ;;  %v593_v26 = vpop.f32.mrb[1].mxu0 }
 0x115   :  { %v125_v27 = vpop.f32.mrb[2].mxu0 }
 0x116   :  { %v128_v28 = vmax.f32 %v123_v25, 0.0  ;;  %v594_v29 = vpop.f32.mrb[3].mxu0 }
 0x118   :  { %v129_v30 = vpack.c.bf16 %v128_v28, %v128_v28 }
 0x11a   :  { %612 = vmatmul.mubr.bf16.vlgmr.msra.gmra.mrb[0].mxu1 %v129_v30 }
 0x11b   :  { %651 = vmatprep.mubr.msk.bf16.mxu1 %vm797_vm0, %v796_v0  ;;  %636 = vmatpush3.bf16.msra.mxu1 %v689_v33 }
 0x11c   :  { %637 = vmatprep.subr.bf16.mxu1 %v796_v0 }
 0x11f   :  { %638 = vmatpush3.bf16.msra.mxu1 %v690_v34 }
 0x120   :  { %639 = vmatprep.subr.bf16.mxu1 %v796_v0 }
 0x123   :  { %640 = vmatpush3.bf16.msra.mxu1 %v691_v35 }
 0x124   :  { %641 = vmatprep.subr.bf16.mxu1 %v796_v0 }
 0x127   :  { %642 = vmatpush3.bf16.msra.mxu1 %v692_v36 }
 0x128   :  { %643 = vmatprep.subr.bf16.mxu1 %v796_v0 }
 0x12b   :  { %644 = vmatpush3.bf16.msra.mxu1 %v693_v37 }
 0x12c   :  { %645 = vmatprep.subr.bf16.mxu1 %v796_v0 }
 0x12f   :  { %646 = vmatpush3.bf16.msra.mxu1 %v694_v38 }
 0x130   :  { %647 = vmatprep.subr.bf16.mxu1 %v796_v0 }
 0x133   :  { %648 = vmatpush3.bf16.msra.mxu1 %v695_v48 }
 0x134   :  { %649 = vmatprep.subr.bf16.mxu1 %v796_v0 }
 0x137   :  { %650 = vmatpush3.bf16.msra.mxu1 %v696_v49 }
 0x1ed   :  { %v232_v41 = vpop.f32.mrb[0].mxu1 }
 0x1ee   :  { %v233_v42 = vadd.f32 %v232_v41, %v149_v40  ;;  %v613_v43 = vpop.f32.mrb[1].mxu1 }
 0x1ef   :  { %v235_v44 = vpop.f32.mrb[2].mxu1 }
 0x1f0   :  { %v238_v45 = vmax.f32 %v233_v42, 0.0  ;;  %v614_v46 = vpop.f32.mrb[3].mxu1 }
 0x1f2   :  { %v239_v47 = vpack.c.bf16 %v238_v45, %v238_v45 }
 0x1f4   :  { %632 = vmatmul.mubr.bf16.vlgmr.msra.gmra.mrb[4].mxu0 %v239_v47 }
 0x1f5   :  { %657 = vmatprep.mubr.msk.bf16.mxu0 %vm797_vm0, %v796_v0 }
 0x2c7   :  { %v343_v52 = vpop.f32.mrb[4].mxu0 }
 0x2c8   :  { %v344_v53 = vadd.f32 %v343_v52, %v260_v51  ;;  %v633_v54 = vpop.f32.mrb[5].mxu0 }
 0x2c9   :  { %v346_v55 = vpop.f32.mrb[6].mxu0 }
 0x2ca   :  { %v349_v56 = vmax.f32 %v344_v53, 0.0  ;;  %v634_v57 = vpop.f32.mrb[7].mxu0 }
 0x2cc   :  { %v350_v58 = vpack.c.bf16 %v349_v56, %v349_v56 }
 0x2ce   :  { %652 = vmatmul.mubr.bf16.vlgmr.msra.gmra.mrb[4].mxu1 %v350_v58 }
 0x3a1   :  { %v454_v62 = vpop.f32.mrb[4].mxu1 }
 0x3a2   :  { %v455_v63 = vadd.f32 %v454_v62, %v371_v61  ;;  %v653_v0 = vpop.f32.mrb[5].mxu1 }
 0x3a3   :  { %v457_v1 = vpop.f32.mrb[6].mxu1 }
 0x3a4   :  { %v460_v2 = vmax.f32 %v455_v63, 0.0  ;;  %v654_v3 = vpop.f32.mrb[7].mxu1 }
 0x3a6   :  { %v461_v4 = vpack.c.bf16 %v460_v2, %v460_v2 }
 0x3a8   :  { %656 = vmatpush3.bf16.xpose.msra.mxu0 %v461_v4 }
 0x3af   :  { %658 = vmatmul.mubr.bf16.vlgmr.msra.gmra.mrb[8].mxu0 %v462_v5 }
 0x482   :  { %v497_v8 = vpop.f32.mrb[8].mxu0 }
 0x483   :  { %v509_v9 = vadd.f32 %v507_v7, %v497_v8  ;;  %v659_v10 = vpop.f32.mrb[9].mxu0 }
 0x484   :  { %v500_v11 = vpop.f32.mrb[10].mxu0 }
 0x485   :  { %v660_v12 = vpop.f32.mrb[11].mxu0  ;;  %511 = vst.msk [vmem:[#allocation8] sm:$0x1] %vm510_vm2, %v509_v9 }
 0x486   :  { %774 = shalt.err (!%p771_p0)
}
 0x487   :  { %s775_s11 = scalar_lea.hbm %s945_s5, 16 }
 0x488   :  { %p776_p1 = scmp.ne.s32.totalorder %s945_s5, %s775_s11  ;;  %p779_p2 = scmp.lt.u32.totalorder %s775_s11, %s945_s5 }
 0x48a   :  { %p781_p3 = pnand %p779_p2, %p776_p1 }
 0x48c   :  { %784 = shalt.err (!%p781_p3)
}
 0x48d   :  { %521 = dma.vmem_to_hbm [thread:$0]  %s519_s7, 16, %s945_s5, [#allocation4]  }
 0x48e   :  { %789 = dma.done.wait [#allocation4], 16  }
 0x48f   :  { %790 = vsyncadd [#allocation4], 4294967280 }
 0x490   :  { %525 = vsyncpa [#allocation3], 1 }
 0x491   :  { %526 = vsyncpa [#allocation6], 1 }
 0x492   :  { %527 = vsyncpa [#allocation4], 1 }

</bundles_post_ra>
